<compile_context>
chip_gen: v7x
topology: tpu7x:2x2x1
jax: 0.10.0
libtpu: 0.0.40
codegen_flags: <defaults>
</compile_context>

<pallas_src>
import math
import functools

import jax
import jax.numpy as jnp
from jax.experimental import pallas as pl
from jax.experimental.pallas import tpu as pltpu


def simple_func_kernel(src_ref, aux_ref, w_ref, out_ref, *, B, S, D, H, HID):
    hd = D // H

    x = src_ref[...].reshape(B * S, D)                      # (B*S, D)

    aux = aux_ref[...]                                      # (B*S, 128), one DMA
    row_mask = aux[:, 0:1]                                  # (B*S, 1)  1.0 = masked row
    key_bias = aux[0:B, 8:8 + S]                            # (B, S)    -1e30 at masked keys

    # ---- static slices of the packed weight slab (offsets only, no extra DMAs) ----
    wqkv = w_ref[0:D, 0:3 * D]                              # (D, 3D), Q cols pre-scaled by 1/sqrt(hd)
    wo = w_ref[D:2 * D, 0:D]                                # (D, D)
    w1 = w_ref[2 * D:3 * D, 0:HID]                          # (D, HID)
    w2 = w_ref[3 * D:3 * D + HID, 0:D]                      # (HID, D)
    bias_tile = w_ref[3 * D + HID:3 * D + HID + 8, :]       # one aligned (8, 128) tile
    bqkv = bias_tile[0:1, 0:3 * D]
    bo = bias_tile[1:2, 0:D]
    ln1w = bias_tile[2:3, 0:D]
    ln1b = bias_tile[3:4, 0:D]
    b1 = bias_tile[4:5, 0:HID]
    b2 = bias_tile[5:6, 0:D]
    ln2w = bias_tile[6:7, 0:D]
    ln2b = bias_tile[7:8, 0:D]

    # ---- fused QKV projection: one lane-dense (B*S, D) @ (D, 3D) MXU matmul ----
    qkv = jnp.dot(x, wqkv, preferred_element_type=jnp.float32) + bqkv    # (B*S, 3D)
    qkv = qkv.reshape(B, S, 3 * D)

    # ---- head-batched attention over a fused (H*B) axis; heads = static lane slices ----
    q = jnp.concatenate([qkv[:, :, h * hd:(h + 1) * hd] for h in range(H)], axis=0)
    k = jnp.concatenate([qkv[:, :, D + h * hd:D + (h + 1) * hd] for h in range(H)], axis=0)
    v = jnp.concatenate([qkv[:, :, 2 * D + h * hd:2 * D + (h + 1) * hd] for h in range(H)], axis=0)

    # key_padding_mask bias: plain VPU broadcast add (no MXU outer product, no transpose)
    kb = jnp.tile(key_bias, (H, 1))[:, None, :]                          # (H*B, 1, S)

    scores = jnp.einsum('nqe,nke->nqk', q, k,
                        preferred_element_type=jnp.float32) + kb         # (H*B, S, S)
    scores = scores - jnp.max(scores, axis=-1, keepdims=True)
    p = jnp.exp(scores)
    p = p * pl.reciprocal(jnp.sum(p, axis=-1, keepdims=True), approx=True)

    ctx = jnp.einsum('nqk,nke->nqe', p, v,
                     preferred_element_type=jnp.float32)                 # (H*B, S, hd)

    # ---- lane repack of heads + single dense out-projection (depth-32 contraction) ----
    ctx_cat = jnp.concatenate([ctx[h * B:(h + 1) * B] for h in range(H)], axis=-1)  # (B, S, D)
    attn = jnp.dot(ctx_cat.reshape(B * S, D), wo,
                   preferred_element_type=jnp.float32) + bo              # (B*S, D)

    # ---- LayerNorm 1 (over last dim, eps=1e-5) ----
    mu1 = jnp.mean(attn, axis=-1, keepdims=True)
    c1 = attn - mu1
    var1 = jnp.mean(c1 * c1, axis=-1, keepdims=True)
    y = c1 * jax.lax.rsqrt(var1 + 1e-5) * ln1w + ln1b

    # ---- FFN: relu(linear1) -> dropout(identity in eval) -> relu(linear2) ----
    h1 = jnp.maximum(jnp.dot(y, w1, preferred_element_type=jnp.float32) + b1, 0.0)
    h2 = jnp.maximum(jnp.dot(h1, w2, preferred_element_type=jnp.float32) + b2, 0.0)

    # ---- masked_fill(mask == 1, 0) then LayerNorm 2 ----
    h2 = jnp.where(row_mask > 0.5, 0.0, h2)
    mu2 = jnp.mean(h2, axis=-1, keepdims=True)
    c2 = h2 - mu2
    var2 = jnp.mean(c2 * c2, axis=-1, keepdims=True)
    out = c2 * jax.lax.rsqrt(var2 + 1e-5) * ln2w + ln2b

    out_ref[...] = out.reshape(B, S, D).astype(out_ref.dtype)


def simple_func_forward(src, func_mask, w_slab, num_heads, dim_hid):
    B, S, D = src.shape
    assert 8 + S <= 128, "aux-slab packing assumes S <= 120"

    mask_f = func_mask.astype(jnp.float32)                   # (B, S), 1.0 = masked
    # Single aux slab carrying BOTH mask orientations (one DMA):
    #   lane 0,        rows [0, B*S): sublane-oriented row mask for masked_fill
    #   lanes [8,8+S), rows [0, B)  : lane-oriented -1e30 key-padding bias
    aux = jnp.zeros((B * S, 128), jnp.float32)
    aux = aux.at[:, 0].set(mask_f.reshape(B * S))
    aux = aux.at[:B, 8:8 + S].set(mask_f * (-1e30))

    kernel = functools.partial(simple_func_kernel, B=B, S=S, D=D,
                               H=num_heads, HID=dim_hid)

    # Grid-less, single full-block invocation: nothing to pipeline at this size, and the
    # whole problem (src 2 KiB + aux 8 KiB + weights 84 KiB) trivially fits VMEM.
    return pl.pallas_call(
        kernel,
        out_shape=jax.ShapeDtypeStruct((B, S, D), src.dtype),
        in_specs=[pl.BlockSpec(memory_space=pltpu.MemorySpace.VMEM)] * 3,
        out_specs=pl.BlockSpec(memory_space=pltpu.MemorySpace.VMEM),
    )(src, aux, w_slab)


def init_params(key, D, HID):
    """Deterministic synthetic parameters, PyTorch-like. Linear weights stored as (in, out)."""
    ks = jax.random.split(key, 12)
    n = lambda k, shape, s=0.1: jax.random.normal(k, shape, jnp.float32) * s
    return {
        # MultiheadAttention in_proj (Wq/Wk/Wv) + out_proj
        "wq": n(ks[0], (D, D)), "bq": n(ks[1], (1, D), 0.02),
        "wk": n(ks[2], (D, D)), "bk": n(ks[3], (1, D), 0.02),
        "wv": n(ks[4], (D, D)), "bv": n(ks[5], (1, D), 0.02),
        "wo": n(ks[6], (D, D)), "bo": n(ks[7], (1, D), 0.02),
        # layernorm1
        "ln1w": jnp.ones((1, D), jnp.float32), "ln1b": jnp.zeros((1, D), jnp.float32),
        # FFN
        "w1": n(ks[8], (D, HID)), "b1": n(ks[9], (1, HID), 0.02),
        "w2": n(ks[10], (HID, D)), "b2": n(ks[11], (1, D), 0.02),
        # layernorm2
        "ln2w": jnp.ones((1, D), jnp.float32), "ln2b": jnp.zeros((1, D), jnp.float32),
    }


def pack_params(params, num_heads):
    """One-time transform of all parameters into a single 128-lane f32 slab.

    Row layout (lanes used in parentheses):
      [0,   D)        w_qkv  (3D)   Q columns/bias pre-scaled by 1/sqrt(hd)
      [D,   2D)       wo     (D)
      [2D,  3D)       w1     (HID)
      [3D,  3D+HID)   w2     (D)
      [3D+HID, +8)    bias/LN rows: b_qkv, bo, ln1w, ln1b, b1, b2, ln2w, ln2b
    """
    D = params["wq"].shape[0]
    HID = params["w1"].shape[1]
    hd = D // num_heads
    scale = 1.0 / math.sqrt(hd)
    assert 3 * D <= 128 and HID <= 128, "slab packing assumes each row fits 128 lanes"

    w_qkv = jnp.concatenate([params["wq"] * scale, params["wk"], params["wv"]], axis=1)  # (D, 3D)
    b_qkv = jnp.concatenate([params["bq"] * scale, params["bk"], params["bv"]], axis=1)  # (1, 3D)

    n_rows = 3 * D + HID + 8
    slab = jnp.zeros((n_rows, 128), jnp.float32)

    def put(s, row, arr):
        r, c = arr.shape
        return s.at[row:row + r, 0:c].set(arr)

    slab = put(slab, 0, w_qkv)
    slab = put(slab, D, params["wo"])
    slab = put(slab, 2 * D, params["w1"])
    slab = put(slab, 3 * D, params["w2"])
    base = 3 * D + HID
    for i, arr in enumerate((b_qkv, params["bo"], params["ln1w"], params["ln1b"],
                             params["b1"], params["b2"], params["ln2w"], params["ln2b"])):
        slab = put(slab, base + i, arr)
    return slab


if __name__ == "__main__":
    B, S, D, HID, NUM_HEADS = 2, 8, 32, 64, 4   # dim_model=32, dim_hid=64, num_heads=4
    key = jax.random.PRNGKey(0)
    k_src, k_par = jax.random.split(key)

    src = jax.random.normal(k_src, (B, S, D), jnp.float32)
    # func_mask: True = position is masked (key_padding_mask / masked_fill)
    func_mask = jnp.zeros((B, S), jnp.bool_).at[:, -1].set(True)

    params = init_params(k_par, D, HID)
    w_slab = pack_params(params, NUM_HEADS)     # one-time parameter transform

    out = simple_func_forward(src, func_mask, w_slab, NUM_HEADS, HID)
    out = jax.block_until_ready(out)

    assert out.shape == (B, S, D) and out.dtype == jnp.float32
    assert bool(jnp.all(jnp.isfinite(out)))
    print("KERNEL_OK")
</pallas_src>

<mosaic_0001>
module attributes {stable_mosaic.version = 11 : i64} {
  func.func @simple_func_kernel(%arg0: memref<2x8x32xf32, #tpu.memory_space<vmem>>, %arg1: memref<16x128xf32, #tpu.memory_space<vmem>>, %arg2: memref<168x128xf32, #tpu.memory_space<vmem>>, %arg3: memref<2x8x32xf32, #tpu.memory_space<vmem>>) attributes {dimension_semantics = [], scalar_prefetch = 0 : i64, scratch_operands = 0 : i64, tpu.core_type = #tpu.core_type<tc>} {
    %c0 = arith.constant 0 : index
    %c0_0 = arith.constant 0 : index
    %c0_1 = arith.constant 0 : index
    %0 = vector.load %arg0[%c0, %c0_0, %c0_1] : memref<2x8x32xf32, #tpu.memory_space<vmem>>, vector<2x8x32xf32>
    %1 = vector.shape_cast %0 : vector<2x8x32xf32> to vector<16x32xf32>
    %c0_2 = arith.constant 0 : index
    %c0_3 = arith.constant 0 : index
    %2 = vector.load %arg1[%c0_2, %c0_3] : memref<16x128xf32, #tpu.memory_space<vmem>>, vector<16x128xf32>
    %3 = vector.extract_strided_slice %2 {offsets = [0, 0], sizes = [16, 1], strides = [1, 1]} : vector<16x128xf32> to vector<16x1xf32>
    %4 = vector.extract_strided_slice %2 {offsets = [0, 8], sizes = [2, 8], strides = [1, 1]} : vector<16x128xf32> to vector<2x8xf32>
    %c0_4 = arith.constant 0 : index
    %c0_5 = arith.constant 0 : index
    %5 = vector.load %arg2[%c0_4, %c0_5] : memref<168x128xf32, #tpu.memory_space<vmem>>, vector<32x96xf32>
    %c32 = arith.constant 32 : index
    %c0_6 = arith.constant 0 : index
    %6 = vector.load %arg2[%c32, %c0_6] : memref<168x128xf32, #tpu.memory_space<vmem>>, vector<32x32xf32>
    %c64 = arith.constant 64 : index
    %c0_7 = arith.constant 0 : index
    %7 = vector.load %arg2[%c64, %c0_7] : memref<168x128xf32, #tpu.memory_space<vmem>>, vector<32x64xf32>
    %c96 = arith.constant 96 : index
    %c0_8 = arith.constant 0 : index
    %8 = vector.load %arg2[%c96, %c0_8] : memref<168x128xf32, #tpu.memory_space<vmem>>, vector<64x32xf32>
    %c160 = arith.constant 160 : index
    %c0_9 = arith.constant 0 : index
    %9 = vector.load %arg2[%c160, %c0_9] : memref<168x128xf32, #tpu.memory_space<vmem>>, vector<8x128xf32>
    %10 = vector.extract_strided_slice %9 {offsets = [0, 0], sizes = [1, 96], strides = [1, 1]} : vector<8x128xf32> to vector<1x96xf32>
    %11 = vector.extract_strided_slice %9 {offsets = [1, 0], sizes = [1, 32], strides = [1, 1]} : vector<8x128xf32> to vector<1x32xf32>
    %12 = vector.extract_strided_slice %9 {offsets = [2, 0], sizes = [1, 32], strides = [1, 1]} : vector<8x128xf32> to vector<1x32xf32>
    %13 = vector.extract_strided_slice %9 {offsets = [3, 0], sizes = [1, 32], strides = [1, 1]} : vector<8x128xf32> to vector<1x32xf32>
    %14 = vector.extract_strided_slice %9 {offsets = [4, 0], sizes = [1, 64], strides = [1, 1]} : vector<8x128xf32> to vector<1x64xf32>
    %15 = vector.extract_strided_slice %9 {offsets = [5, 0], sizes = [1, 32], strides = [1, 1]} : vector<8x128xf32> to vector<1x32xf32>
    %16 = vector.extract_strided_slice %9 {offsets = [6, 0], sizes = [1, 32], strides = [1, 1]} : vector<8x128xf32> to vector<1x32xf32>
    %17 = vector.extract_strided_slice %9 {offsets = [7, 0], sizes = [1, 32], strides = [1, 1]} : vector<8x128xf32> to vector<1x32xf32>
    %cst = arith.constant dense<0.000000e+00> : vector<16x96xf32>
    %18 = tpu.matmul %1, %5, %cst {dimension_numbers = #tpu.dot_dimension_numbers<[1], [0], [0], [1], [0, 0, 1, 1], [], []>} : vector<16x32xf32>, vector<32x96xf32>, vector<16x96xf32> -> vector<16x96xf32>
    %19 = vector.broadcast %10 : vector<1x96xf32> to vector<16x96xf32>
    %20 = arith.addf %18, %19 : vector<16x96xf32>
    %21 = vector.shape_cast %20 : vector<16x96xf32> to vector<2x8x96xf32>
    %22 = vector.extract_strided_slice %21 {offsets = [0, 0, 0], sizes = [2, 8, 8], strides = [1, 1, 1]} : vector<2x8x96xf32> to vector<2x8x8xf32>
    %23 = vector.extract_strided_slice %21 {offsets = [0, 0, 8], sizes = [2, 8, 8], strides = [1, 1, 1]} : vector<2x8x96xf32> to vector<2x8x8xf32>
    %24 = vector.extract_strided_slice %21 {offsets = [0, 0, 16], sizes = [2, 8, 8], strides = [1, 1, 1]} : vector<2x8x96xf32> to vector<2x8x8xf32>
    %25 = vector.extract_strided_slice %21 {offsets = [0, 0, 24], sizes = [2, 8, 8], strides = [1, 1, 1]} : vector<2x8x96xf32> to vector<2x8x8xf32>
    %26 = tpu.concatenate %22, %23, %24, %25 in 0 : vector<2x8x8xf32>, vector<2x8x8xf32>, vector<2x8x8xf32>, vector<2x8x8xf32> -> vector<8x8x8xf32>
    %27 = vector.extract_strided_slice %21 {offsets = [0, 0, 32], sizes = [2, 8, 8], strides = [1, 1, 1]} : vector<2x8x96xf32> to vector<2x8x8xf32>
    %28 = vector.extract_strided_slice %21 {offsets = [0, 0, 40], sizes = [2, 8, 8], strides = [1, 1, 1]} : vector<2x8x96xf32> to vector<2x8x8xf32>
    %29 = vector.extract_strided_slice %21 {offsets = [0, 0, 48], sizes = [2, 8, 8], strides = [1, 1, 1]} : vector<2x8x96xf32> to vector<2x8x8xf32>
    %30 = vector.extract_strided_slice %21 {offsets = [0, 0, 56], sizes = [2, 8, 8], strides = [1, 1, 1]} : vector<2x8x96xf32> to vector<2x8x8xf32>
    %31 = tpu.concatenate %27, %28, %29, %30 in 0 : vector<2x8x8xf32>, vector<2x8x8xf32>, vector<2x8x8xf32>, vector<2x8x8xf32> -> vector<8x8x8xf32>
    %32 = vector.extract_strided_slice %21 {offsets = [0, 0, 64], sizes = [2, 8, 8], strides = [1, 1, 1]} : vector<2x8x96xf32> to vector<2x8x8xf32>
    %33 = vector.extract_strided_slice %21 {offsets = [0, 0, 72], sizes = [2, 8, 8], strides = [1, 1, 1]} : vector<2x8x96xf32> to vector<2x8x8xf32>
    %34 = vector.extract_strided_slice %21 {offsets = [0, 0, 80], sizes = [2, 8, 8], strides = [1, 1, 1]} : vector<2x8x96xf32> to vector<2x8x8xf32>
    %35 = vector.extract_strided_slice %21 {offsets = [0, 0, 88], sizes = [2, 8, 8], strides = [1, 1, 1]} : vector<2x8x96xf32> to vector<2x8x8xf32>
    %36 = tpu.concatenate %32, %33, %34, %35 in 0 : vector<2x8x8xf32>, vector<2x8x8xf32>, vector<2x8x8xf32>, vector<2x8x8xf32> -> vector<8x8x8xf32>
    %37 = tpu.concatenate %4, %4, %4, %4 in 0 : vector<2x8xf32>, vector<2x8xf32>, vector<2x8xf32>, vector<2x8xf32> -> vector<8x8xf32>
    %38 = vector.shape_cast %37 : vector<8x8xf32> to vector<8x1x8xf32>
    "tpu.trace_start"() <{level = 10 : i32, message = "nqe,nke->nqk"}> : () -> ()
    %cst_10 = arith.constant dense<0.000000e+00> : vector<8x8x8xf32>
    %39 = tpu.matmul %26, %31, %cst_10 {dimension_numbers = #tpu.dot_dimension_numbers<[2], [2], [1], [1], [0, 0, 0, 1, 1, 1], [0], [0]>} : vector<8x8x8xf32>, vector<8x8x8xf32>, vector<8x8x8xf32> -> vector<8x8x8xf32>
    "tpu.trace_stop"() : () -> ()
    %40 = vector.broadcast %38 : vector<8x1x8xf32> to vector<8x8x8xf32>
    %41 = arith.addf %39, %40 : vector<8x8x8xf32>
    %cst_11 = arith.constant dense<0xFF800000> : vector<8x8xf32>
    %42 = vector.multi_reduction <maximumf>, %41, %cst_11 [2] : vector<8x8x8xf32> to vector<8x8xf32>
    %43 = vector.shape_cast %42 : vector<8x8xf32> to vector<8x8x1xf32>
    %44 = vector.broadcast %43 : vector<8x8x1xf32> to vector<8x8x8xf32>
    %45 = arith.subf %41, %44 : vector<8x8x8xf32>
    %46 = math.exp %45 : vector<8x8x8xf32>
    %cst_12 = arith.constant dense<0.000000e+00> : vector<8x8xf32>
    %47 = vector.multi_reduction <add>, %46, %cst_12 [2] : vector<8x8x8xf32> to vector<8x8xf32>
    %48 = vector.shape_cast %47 : vector<8x8xf32> to vector<8x8x1xf32>
    %49 = tpu.reciprocal %48 {approx = true} : vector<8x8x1xf32> -> vector<8x8x1xf32>
    %50 = vector.broadcast %49 : vector<8x8x1xf32> to vector<8x8x8xf32>
    %51 = arith.mulf %46, %50 : vector<8x8x8xf32>
    "tpu.trace_start"() <{level = 10 : i32, message = "nqk,nke->nqe"}> : () -> ()
    %cst_13 = arith.constant dense<0.000000e+00> : vector<8x8x8xf32>
    %52 = tpu.matmul %51, %36, %cst_13 {dimension_numbers = #tpu.dot_dimension_numbers<[2], [1], [1], [2], [0, 0, 0, 1, 1, 2], [0], [0]>} : vector<8x8x8xf32>, vector<8x8x8xf32>, vector<8x8x8xf32> -> vector<8x8x8xf32>
    "tpu.trace_stop"() : () -> ()
    %53 = vector.extract_strided_slice %52 {offsets = [0, 0, 0], sizes = [2, 8, 8], strides = [1, 1, 1]} : vector<8x8x8xf32> to vector<2x8x8xf32>
    %54 = vector.extract_strided_slice %52 {offsets = [2, 0, 0], sizes = [2, 8, 8], strides = [1, 1, 1]} : vector<8x8x8xf32> to vector<2x8x8xf32>
    %55 = vector.extract_strided_slice %52 {offsets = [4, 0, 0], sizes = [2, 8, 8], strides = [1, 1, 1]} : vector<8x8x8xf32> to vector<2x8x8xf32>
    %56 = vector.extract_strided_slice %52 {offsets = [6, 0, 0], sizes = [2, 8, 8], strides = [1, 1, 1]} : vector<8x8x8xf32> to vector<2x8x8xf32>
    %57 = tpu.concatenate %53, %54, %55, %56 in 2 : vector<2x8x8xf32>, vector<2x8x8xf32>, vector<2x8x8xf32>, vector<2x8x8xf32> -> vector<2x8x32xf32>
    %58 = vector.shape_cast %57 : vector<2x8x32xf32> to vector<16x32xf32>
    %cst_14 = arith.constant dense<0.000000e+00> : vector<16x32xf32>
    %59 = tpu.matmul %58, %6, %cst_14 {dimension_numbers = #tpu.dot_dimension_numbers<[1], [0], [0], [1], [0, 0, 1, 1], [], []>} : vector<16x32xf32>, vector<32x32xf32>, vector<16x32xf32> -> vector<16x32xf32>
    %60 = vector.broadcast %11 : vector<1x32xf32> to vector<16x32xf32>
    %61 = arith.addf %59, %60 : vector<16x32xf32>
    %cst_15 = arith.constant dense<0.000000e+00> : vector<16xf32>
    %62 = vector.multi_reduction <add>, %61, %cst_15 [1] : vector<16x32xf32> to vector<16xf32>
    %63 = vector.shape_cast %62 : vector<16xf32> to vector<16x1xf32>
    %cst_16 = arith.constant 3.200000e+01 : f32
    %64 = vector.broadcast %cst_16 : f32 to vector<16x1xf32>
    %65 = arith.divf %63, %64 : vector<16x1xf32>
    %66 = vector.broadcast %65 : vector<16x1xf32> to vector<16x32xf32>
    %67 = arith.subf %61, %66 : vector<16x32xf32>
    %68 = arith.mulf %67, %67 : vector<16x32xf32>
    %cst_17 = arith.constant dense<0.000000e+00> : vector<16xf32>
    %69 = vector.multi_reduction <add>, %68, %cst_17 [1] : vector<16x32xf32> to vector<16xf32>
    %70 = vector.shape_cast %69 : vector<16xf32> to vector<16x1xf32>
    %cst_18 = arith.constant 3.200000e+01 : f32
    %71 = vector.broadcast %cst_18 : f32 to vector<16x1xf32>
    %72 = arith.divf %70, %71 : vector<16x1xf32>
    %cst_19 = arith.constant 9.99999974E-6 : f32
    %73 = vector.broadcast %cst_19 : f32 to vector<16x1xf32>
    %74 = arith.addf %72, %73 : vector<16x1xf32>
    %75 = math.rsqrt %74 : vector<16x1xf32>
    %76 = vector.broadcast %75 : vector<16x1xf32> to vector<16x32xf32>
    %77 = arith.mulf %67, %76 : vector<16x32xf32>
    %78 = vector.broadcast %12 : vector<1x32xf32> to vector<16x32xf32>
    %79 = arith.mulf %77, %78 : vector<16x32xf32>
    %80 = vector.broadcast %13 : vector<1x32xf32> to vector<16x32xf32>
    %81 = arith.addf %79, %80 : vector<16x32xf32>
    %cst_20 = arith.constant dense<0.000000e+00> : vector<16x64xf32>
    %82 = tpu.matmul %81, %7, %cst_20 {dimension_numbers = #tpu.dot_dimension_numbers<[1], [0], [0], [1], [0, 0, 1, 1], [], []>} : vector<16x32xf32>, vector<32x64xf32>, vector<16x64xf32> -> vector<16x64xf32>
    %83 = vector.broadcast %14 : vector<1x64xf32> to vector<16x64xf32>
    %84 = arith.addf %82, %83 : vector<16x64xf32>
    %cst_21 = arith.constant 0.000000e+00 : f32
    %85 = vector.broadcast %cst_21 : f32 to vector<16x64xf32>
    %86 = arith.maximumf %84, %85 : vector<16x64xf32>
    %cst_22 = arith.constant dense<0.000000e+00> : vector<16x32xf32>
    %87 = tpu.matmul %86, %8, %cst_22 {dimension_numbers = #tpu.dot_dimension_numbers<[1], [0], [0], [1], [0, 0, 1, 1], [], []>} : vector<16x64xf32>, vector<64x32xf32>, vector<16x32xf32> -> vector<16x32xf32>
    %88 = vector.broadcast %15 : vector<1x32xf32> to vector<16x32xf32>
    %89 = arith.addf %87, %88 : vector<16x32xf32>
    %cst_23 = arith.constant 0.000000e+00 : f32
    %90 = vector.broadcast %cst_23 : f32 to vector<16x32xf32>
    %91 = arith.maximumf %89, %90 : vector<16x32xf32>
    %cst_24 = arith.constant 5.000000e-01 : f32
    %92 = vector.broadcast %cst_24 : f32 to vector<16x1xf32>
    %93 = arith.cmpf ogt, %3, %92 : vector<16x1xf32>
    %cst_25 = arith.constant 0.000000e+00 : f32
    %94 = vector.shape_cast %93 : vector<16x1xi1> to vector<16x1xi1>
    %95 = vector.broadcast %94 : vector<16x1xi1> to vector<16x32xi1>
    %96 = vector.broadcast %cst_25 : f32 to vector<16x32xf32>
    %97 = arith.select %95, %96, %91 : vector<16x32xi1>, vector<16x32xf32>
    %cst_26 = arith.constant dense<0.000000e+00> : vector<16xf32>
    %98 = vector.multi_reduction <add>, %97, %cst_26 [1] : vector<16x32xf32> to vector<16xf32>
    %99 = vector.shape_cast %98 : vector<16xf32> to vector<16x1xf32>
    %cst_27 = arith.constant 3.200000e+01 : f32
    %100 = vector.broadcast %cst_27 : f32 to vector<16x1xf32>
    %101 = arith.divf %99, %100 : vector<16x1xf32>
    %102 = vector.broadcast %101 : vector<16x1xf32> to vector<16x32xf32>
    %103 = arith.subf %97, %102 : vector<16x32xf32>
    %104 = arith.mulf %103, %103 : vector<16x32xf32>
    %cst_28 = arith.constant dense<0.000000e+00> : vector<16xf32>
    %105 = vector.multi_reduction <add>, %104, %cst_28 [1] : vector<16x32xf32> to vector<16xf32>
    %106 = vector.shape_cast %105 : vector<16xf32> to vector<16x1xf32>
    %cst_29 = arith.constant 3.200000e+01 : f32
    %107 = vector.broadcast %cst_29 : f32 to vector<16x1xf32>
    %108 = arith.divf %106, %107 : vector<16x1xf32>
    %cst_30 = arith.constant 9.99999974E-6 : f32
    %109 = vector.broadcast %cst_30 : f32 to vector<16x1xf32>
    %110 = arith.addf %108, %109 : vector<16x1xf32>
    %111 = math.rsqrt %110 : vector<16x1xf32>
    %112 = vector.broadcast %111 : vector<16x1xf32> to vector<16x32xf32>
    %113 = arith.mulf %103, %112 : vector<16x32xf32>
    %114 = vector.broadcast %16 : vector<1x32xf32> to vector<16x32xf32>
    %115 = arith.mulf %113, %114 : vector<16x32xf32>
    %116 = vector.broadcast %17 : vector<1x32xf32> to vector<16x32xf32>
    %117 = arith.addf %115, %116 : vector<16x32xf32>
    %118 = vector.shape_cast %117 : vector<16x32xf32> to vector<2x8x32xf32>
    %c0_31 = arith.constant 0 : index
    %c0_32 = arith.constant 0 : index
    %c0_33 = arith.constant 0 : index
    %119 = vector.load %arg3[%c0_31, %c0_32, %c0_33] : memref<2x8x32xf32, #tpu.memory_space<vmem>>, vector<2x8x32xf32>
    tpu.vector_store %arg3[%c0_31, %c0_32, %c0_33], %118 {strides = array<i32>} : memref<2x8x32xf32, #tpu.memory_space<vmem>>, vector<2x8x32xf32>,
    return
  }
}

</mosaic_0001>

<bundles_post_ra>
// kernel: tpu_custom_call.1
= control target key start
LH: loop header
LB: loop body
LE: loop exit
PB: predicated region body
PF: predicated region fallthrough
CT: control target
= control target key end

     0   :  { %8 = vsyncpa [#allocation3], 0  ;;  %s2760_s0 = inlined_call_operand.hbm [shape: f32[2,8,32], index: 0, kind: input, shape index: {}]   ;;  %s2761_s1 = inlined_call_operand.hbm [shape: f32[16,128], index: 1, kind: input, shape index: {}]   ;;  %s2762_s2 = inlined_call_operand.hbm [shape: f32[168,128], index: 2, kind: input, shape index: {}]   ;;  %s2763_s3 = inlined_call_operand.hbm [shape: f32[2,8,32], index: 3, kind: output, shape index: {}]  }
   0x1   :  { %9 = vsyncpa [#allocation6], 0 }
   0x2   :  { %10 = vsyncpa [#allocation4], 0  ;;  %s2425_s12 = smov [#allocation5]   ;;  %s2426_s14 = smov [#allocation2]  }
   0x3   :  { %s28_s13 = sshll.u32 %s2425_s12, 4  ;;  %s16_s15 = sshll.u32 %s2426_s14, 4  ;;  %s29_s13 = int_to_ptr.vmem [resolvable:$true] %s28_s13  ;;  %s2462_s15 = int_to_ptr.vmem [resolvable:$true] %s16_s15 }
   0x4   :  { %s2331_s18 = scalar_lea.hbm %s2761_s1, 256 }
   0x5   :  { %p2332_p0 = scmp.ne.s32.totalorder %s2761_s1, %s2331_s18  ;;  %p2335_p1 = scmp.lt.u32.totalorder %s2331_s18, %s2761_s1 }
   0x7   :  { %p2337_p2 = pnand %p2335_p1, %p2332_p0 }
   0x9   :  { %2340 = shalt.err (!%p2337_p2)
}
   0xa   :  { %s2341_s23 = scalar_lea.vmem %s29_s13, 256  ;;  %p2346_p4 = scmp.lt.s32.totalorder %s29_s13, %s29_s13 }
   0xb   :  { %p2342_p3 = scmp.ne.s32.totalorder %s29_s13, %s2341_s23  ;;  %p2347_p5 = scmp.lt.s32.totalorder %s2341_s23, %s2341_s23 }
   0xd   :  { %p2348_p6 = por %p2347_p5, %p2346_p4 }
   0xf   :  { %p2349_p7 = pnand %p2348_p6, %p2342_p3 }
  0x11   :  { %2352 = shalt.err (!%p2349_p7)
}
  0x12   :  { %s2427_s24 = smov 128   ;;  %s2428_s25 = smov 8  }
  0x13   :  { %34 = dma.hbm_to_vmem [thread:$0]  %s2761_s1, 256, %s29_s13, [#allocation6], %s2427_s24, %s2427_s24, %s2428_s25  }
  0x14   :  { %s2353_s30 = scalar_lea.hbm %s2760_s0, 256 }
  0x15   :  { %p2354_p8 = scmp.ne.s32.totalorder %s2760_s0, %s2353_s30  ;;  %p2357_p9 = scmp.lt.u32.totalorder %s2353_s30, %s2760_s0 }
  0x17   :  { %p2359_p10 = pnand %p2357_p9, %p2354_p8 }
  0x19   :  { %2362 = shalt.err (!%p2359_p10)
}
  0x1a   :  { %s2363_s8 = scalar_lea.vmem %s2462_s15, 256  ;;  %p2368_p12 = scmp.lt.s32.totalorder %s2462_s15, %s2462_s15 }
  0x1b   :  { %p2364_p11 = scmp.ne.s32.totalorder %s2462_s15, %s2363_s8  ;;  %p2369_p13 = scmp.lt.s32.totalorder %s2363_s8, %s2363_s8 }
  0x1d   :  { %p2370_p0 = por %p2369_p13, %p2368_p12 }
  0x1f   :  { %p2371_p1 = pnand %p2370_p0, %p2364_p11 }
  0x21   :  { %2374 = shalt.err (!%p2371_p1)
}
  0x22   :  { %22 = dma.hbm_to_vmem [thread:$0]  %s2760_s0, 256, %s2462_s15, [#allocation3], %s2427_s24, %s2427_s24, %s2428_s25  }
  0x23   :  { %s2429_s10 = smov [#allocation7]   ;;  %s2375_s14 = scalar_lea.hbm %s2762_s2, 2688 }
  0x24   :  { %s40_s11 = sshll.u32 %s2429_s10, 4  ;;  %p2376_p2 = scmp.ne.s32.totalorder %s2762_s2, %s2375_s14  ;;  %s41_s11 = int_to_ptr.vmem [resolvable:$true] %s40_s11 }
  0x25   :  { %p2379_p3 = scmp.lt.u32.totalorder %s2375_s14, %s2762_s2 }
  0x27   :  { %p2381_p4 = pnand %p2379_p3, %p2376_p2 }
  0x29   :  { %2384 = shalt.err (!%p2381_p4)
}
  0x2a   :  { %s2385_s20 = scalar_lea.vmem %s41_s11, 2688  ;;  %p2390_p6 = scmp.lt.s32.totalorder %s41_s11, %s41_s11 }
  0x2b   :  { %p2386_p5 = scmp.ne.s32.totalorder %s41_s11, %s2385_s20  ;;  %p2391_p7 = scmp.lt.s32.totalorder %s2385_s20, %s2385_s20 }
  0x2d   :  { %p2392_p8 = por %p2391_p7, %p2390_p6 }
  0x2f   :  { %p2393_p9 = pnand %p2392_p8, %p2386_p5 }
  0x31   :  { %2396 = shalt.err (!%p2393_p9)
}
  0x32   :  { %46 = dma.hbm_to_vmem [thread:$0]  %s2762_s2, 2688, %s41_s11, [#allocation6], %s2427_s24, %s2427_s24, %s2428_s25  }
  0x33   :  { %2419 = dma.done.wait [#allocation3], 256  }
  0x34   :  { %2420 = vsyncadd [#allocation3], 4294967040 }
  0x35   :  { %2421 = dma.done.wait [#allocation6], 2944  }
  0x36   :  { %2422 = vsyncadd [#allocation6], 4294964352  ;;  %vm85_vm0 = vcmask 261120   ;;  %v60_v0 = vld [vmem:[#allocation7] sm:$0xff]  ;;  %v61_v1 = vld [vmem:[#allocation7 + $0x8] sm:$0xff]  ;;  %v81_v8 = vlaneseq  ;;  %v2430_v14 = vmov 0.0  }
  0x37   :  { %v62_v2 = vld [vmem:[#allocation7 + $0x10] sm:$0xff]  ;;  %v2232_v3 = vpack.c.bf16 %v61_v1, %v60_v0  ;;  %v63_v4 = vld [vmem:[#allocation7 + $0x18] sm:$0xff]  ;;  %v56_v5 = vld [vmem:[#allocation2] sm:$0xff]  ;;  %2121 = vmatprep.subr.mxu0 %v2430_v14  ;;  %s2431_s2 = smov 112   ;;  %s2432_s21 = smov 120   ;;  %vm2433_vm1 = vmmov 0  }
  0x38   :  { %v2236_v6 = vpack.c.bf16 %v63_v4, %v62_v2  ;;  %2108 = vmatprep.mubr.msk.f32.mxu1 %vm85_vm0, %v56_v5  ;;  %v57_v7 = vld [vmem:[#allocation2 + $0x8] sm:$0xff]  ;;  %v2516_v9 = vshrl.u32 %v81_v8, 7  ;;  %v2521_v11 = vld [vmem:[#allocation7 + $0xa0] sm:$0xff]  ;;  %2123 = vmatprep.mubr.msk.f32.mxu0 %vm2433_vm1, %v2430_v14  ;;  %s2434_s22 = smov 104   ;;  %s2435_s23 = smov 96   ;;  %v2547_v18 = vld [vmem:[#allocation5] sm:$0xff] }
  0x39   :  { %2233 = vmatprep.subr.bf16.mxu1 %v2232_v3  ;;  %v182_v19 = vrot.slane %v2547_v18, 6  ;;  %vm188_vm2 = vcmask 1041408   ;;  %v2436_v20 = vmov 1966171168   ;;  %v184_v22 = vrot.slane %v2547_v18, 4  ;;  %s2437_s26 = smov 64  }
  0x3a   :  { %2235 = vmatpush3.bf16.msra.mxu1 %v2232_v3  ;;  %v2519_v10 = vsub.s32 0, %v2516_v9  ;;  %v197_v21 = vunpack.c.l.s4 %v2436_v20  ;;  %vm190_vm3 = vcmask 1043456   ;;  %v186_v25 = vrot.slane %v2547_v18, 2  ;;  %s2438_s27 = smov 16   ;;  %s2439_s28 = smov 24  }
  0x3b   :  { %2237 = vmatprep.subr.bf16.mxu1 %v2236_v6  ;;  %v189_v23 = vsel %vm188_vm2, %v2547_v18, %v182_v19  ;;  %vm192_vm4 = vcmask 1045504   ;;  %vm281_vm5 = vcmask 64512   ;;  %vm1631_vm6 = vcmask 130048   ;;  %s2441_s29 = smov [#allocation8]  }
  0x3c   :  { %v84_v12 = vrot.slane %v2521_v11, %v2519_v10  ;;  %v198_v24 = vunpack.c.0.s8 %v197_v21  ;;  %v191_v26 = vsel %vm190_vm3, %v189_v23, %v184_v22  ;;  %vm1634_vm7 = vcmask 195584   ;;  %s1995_s30 = sshll.u32 %s2441_s29, 4  ;;  %s1996_s30 = int_to_ptr.vmem [resolvable:$true] %s1995_s30 }
  0x3d   :  { %v193_v28 = vsel %vm192_vm4, %v191_v26, %v186_v25  ;;  %vm1936_vm8 = vcmp.gt.f32.partialorder %v2547_v18, 0.5  ;;  %vm1852_vm10 = vcmask 523264   ;;  %v1850_v18 = vsub.s32 5, %v2516_v9  ;;  %s2397_s4 = scalar_lea.vmem %s1996_s30, 256  ;;  %p2402_p11 = scmp.lt.s32.totalorder %s1996_s30, %s1996_s30 }
  0x3e   :  { %2239 = vmatpush3.bf16.msra.mxu1 %v2236_v6  ;;  %v201_v27 = vsub.s32 %v198_v24, %v2516_v9  ;;  %v195_v34 = vcombine.high %v193_v28, %v193_v28  ;;  %p2398_p10 = scmp.ne.s32.totalorder %s1996_s30, %s2397_s4  ;;  %p2403_p12 = scmp.lt.s32.totalorder %s2397_s4, %s2397_s4 }
  0x3f   :  { %2111 = vmatprep.subr.mxu1 %v2430_v14 }
  0x40   :  { %v202_v31 = vrot.slane %v193_v28, %v201_v27  ;;  %v209_v41 = vrot.slane %v195_v34, %v201_v27  ;;  %p2404_p13 = por %p2403_p12, %p2402_p11 }
  0x41   :  { %2109 = vmatmul.mubr.msk.f32.vlgmr.msra.gmra.mrb[0].mxu1 %vm85_vm0, %v57_v7 }
  0x42   :  { %2113 = vmatprep.mubr.msk.f32.mxu1 %vm2433_vm1, %v2430_v14  ;;  %v218_v35 = vrot.slane %v202_v31, %v201_v27  ;;  %v210_v36 = vcombine.high %v202_v31, %v202_v31  ;;  %v211_v46 = vcombine.high %v209_v41, %v209_v41  ;;  %v225_v48 = vrot.slane %v209_v41, %v201_v27  ;;  %p2405_p0 = pnand %p2404_p13, %p2398_p10 }
  0x44   :  { %v247_v39 = vrot.slane %v218_v35, %v2519_v10  ;;  %v232_v40 = vrot.slane %v210_v36, %v201_v27  ;;  %v240_v42 = vcombine.high %v218_v35, %v218_v35  ;;  %v239_v51 = vrot.slane %v211_v46, %v201_v27 }
  0x45   :  { %v263_v52 = vrot.slane %v225_v48, %v2519_v10  ;;  %v241_v53 = vcombine.high %v225_v48, %v225_v48 }
  0x46   :  { %v251_v44 = vrot.slane %v232_v40, %v2519_v10  ;;  %v242_v45 = vcombine.high %v232_v40, %v232_v40  ;;  %v255_v47 = vrot.slane %v240_v42, %v2519_v10  ;;  %v267_v54 = vrot.slane %v239_v51, %v2519_v10 }
  0x47   :  { %v243_v55 = vcombine.high %v239_v51, %v239_v51  ;;  %v271_v56 = vrot.slane %v241_v53, %v2519_v10 }
  0x48   :  { %v259_v50 = vrot.slane %v242_v45, %v2519_v10 }
  0x49   :  { %v275_v57 = vrot.slane %v243_v55, %v2519_v10 }
 0x114   :  { %v2110_v13 = vpop.f32.mrb[0].mxu1 }
 0x115   :  { %v158_v15 = vpop.f32.mrb[1].mxu1  ;;  %v2536_v17 = vadd.f32 %v2110_v13, %v84_v12 }
 0x116   :  { %v2527_v16 = vadd.f32 %v158_v15, %v84_v12 }
 0x118   :  { %173 = vrot.lane.b32.xlu1 %v2527_v16, %s2431_s2  ;;  %169 = vrot.lane.b32.xlu0 %v2527_v16, %s2432_s21 }
 0x11c   :  { %175 = vrot.lane.b32.xlu1 %v2536_v17, %s2431_s2  ;;  %171 = vrot.lane.b32.xlu0 %v2536_v17, %s2432_s21 }
 0x120   :  { %179 = vrot.lane.b32.xlu1 %v2536_v17, %s2434_s22  ;;  %177 = vrot.lane.b32.xlu0 %v2527_v16, %s2434_s22 }
 0x124   :  { %356 = vrot.lane.b32.xlu1 %v2536_v17, %s2435_s23  ;;  %276 = vrot.lane.b32.xlu0 %v2527_v16, %s2435_s23 }
 0x18a   :  { %v2554_v29 = vpop.permute.xlu1 %173  ;;  %v2556_v30 = vpop.permute.xlu0 %169 }
 0x18b   :  { %435 = vrot.lane.b32.xlu0 %v2556_v30, %s2435_s23 }
 0x18e   :  { %v2560_v32 = vpop.permute.xlu1 %175  ;;  %v2562_v33 = vpop.permute.xlu0 %171 }
 0x18f   :  { %593 = vrot.lane.b32.xlu0 %v2554_v29, %s2435_s23  ;;  %514 = vrot.lane.b32.xlu1 %v2562_v33, %s2435_s23 }
 0x192   :  { %v2568_v37 = vpop.permute.xlu0 %177  ;;  %v2574_v38 = vpop.permute.xlu1 %179 }
 0x193   :  { %672 = vrot.lane.b32.xlu1 %v2560_v32, %s2435_s23  ;;  %751 = vrot.lane.b32.xlu0 %v2568_v37, %s2435_s23 }
 0x196   :  { %v277_v43 = vpop.permute.xlu0 %276  ;;  %v357_v49 = vpop.permute.xlu1 %356 }
 0x197   :  { %830 = vrot.lane.b32.xlu1 %v2574_v38, %s2435_s23  ;;  %2112 = vmatpush3.xpose.msk.msra.mxu1 %vm281_vm5, %v277_v43 }
 0x198   :  { %2116 = vmatprep.subr.mxu1 %v2430_v14  ;;  %278 = vrot.lane.b32.xlu0 %v247_v39, %s2432_s21 }
 0x19a   :  { %2114 = vmatmul.mubr.msk.f32.vlgmr.msra.gmra.mrb[2].mxu1 %vm281_vm5, %v2527_v16 }
 0x19b   :  { %2117 = vmatpush3.xpose.msk.msra.mxu1 %vm281_vm5, %v357_v49  ;;  %2118 = vmatprep.mubr.msk.f32.mxu1 %vm2433_vm1, %v2430_v14 }
 0x19c   :  { %358 = vrot.lane.b32.xlu1 %v251_v44, %s2432_s21  ;;  %2126 = vmatprep.subr.mxu1 %v2430_v14 }
 0x19d   :  { %437 = vrot.lane.b32.xlu0 %v255_v47, %s2432_s21 }
 0x19e   :  { %2119 = vmatmul.mubr.msk.f32.vlgmr.msra.gmra.mrb[4].mxu1 %vm281_vm5, %v2536_v17 }
 0x19f   :  { %2128 = vmatprep.mubr.msk.f32.mxu1 %vm2433_vm1, %v2430_v14 }
 0x1a0   :  { %516 = vrot.lane.b32.xlu1 %v259_v50, %s2432_s21 }
 0x1a1   :  { %595 = vrot.lane.b32.xlu0 %v263_v52, %s2432_s21 }
 0x1a4   :  { %674 = vrot.lane.b32.xlu1 %v267_v54, %s2432_s21 }
 0x1a5   :  { %753 = vrot.lane.b32.xlu0 %v271_v56, %s2432_s21 }
 0x1a8   :  { %832 = vrot.lane.b32.xlu1 %v275_v57, %s2432_s21 }
 0x1fd   :  { %v436_v58 = vpop.permute.xlu0 %435 }
 0x1fe   :  { %2122 = vmatpush3.xpose.msk.msra.mxu0 %vm281_vm5, %v436_v58 }
 0x1ff   :  { %2131 = vmatprep.subr.mxu0 %v2430_v14 }
 0x201   :  { %v515_v59 = vpop.permute.xlu1 %514  ;;  %2124 = vmatmul.mubr.msk.f32.vlgmr.msra.gmra.mrb[0].mxu0 %vm281_vm5, %v2556_v30  ;;  %v594_v60 = vpop.permute.xlu0 %593 }
 0x202   :  { %2127 = vmatpush3.xpose.msk.msra.mxu1 %vm281_vm5, %v515_v59  ;;  %2132 = vmatpush3.xpose.msk.msra.mxu0 %vm281_vm5, %v594_v60 }
 0x203   :  { %2133 = vmatprep.mubr.msk.f32.mxu0 %vm2433_vm1, %v2430_v14  ;;  %2136 = vmatprep.subr.mxu1 %v2430_v14 }
 0x204   :  { %2141 = vmatprep.subr.mxu0 %v2430_v14 }
 0x205   :  { %v673_v61 = vpop.permute.xlu1 %672  ;;  %2129 = vmatmul.mubr.msk.f32.vlgmr.msra.gmra.mrb[6].mxu1 %vm281_vm5, %v2562_v33  ;;  %2134 = vmatmul.mubr.msk.f32.vlgmr.msra.gmra.mrb[2].mxu0 %vm281_vm5, %v2554_v29  ;;  %v752_v62 = vpop.permute.xlu0 %751 }
 0x206   :  { %2137 = vmatpush3.xpose.msk.msra.mxu1 %vm281_vm5, %v673_v61  ;;  %2142 = vmatpush3.xpose.msk.msra.mxu0 %vm281_vm5, %v752_v62 }
 0x207   :  { %2138 = vmatprep.mubr.msk.f32.mxu1 %vm2433_vm1, %v2430_v14  ;;  %2143 = vmatprep.mubr.msk.f32.mxu0 %vm2433_vm1, %v2430_v14 }
 0x208   :  { %2146 = vmatprep.subr.mxu1 %v2430_v14  ;;  %2151 = vmatprep.subr.mxu0 %v2430_v14 }
 0x209   :  { %v831_v63 = vpop.permute.xlu1 %830  ;;  %2139 = vmatmul.mubr.msk.f32.vlgmr.msra.gmra.mrb[8].mxu1 %vm281_vm5, %v2560_v32  ;;  %2144 = vmatmul.mubr.msk.f32.vlgmr.msra.gmra.mrb[4].mxu0 %vm281_vm5, %v2568_v37 }
 0x20a   :  { %2147 = vmatpush3.xpose.msk.msra.mxu1 %vm281_vm5, %v831_v63  ;;  %2148 = vmatprep.mubr.msk.f32.mxu1 %vm2433_vm1, %v2430_v14  ;;  %v279_v0 = vpop.permute.xlu0 %278 }
 0x20b   :  { %2156 = vmatprep.subr.mxu1 %v2430_v14  ;;  %2153 = vmatprep.mubr.msk.f32.mxu0 %vm2433_vm1, %v2430_v14 }
 0x20d   :  { %2149 = vmatmul.mubr.msk.f32.vlgmr.msra.gmra.mrb[10].mxu1 %vm281_vm5, %v2574_v38 }
 0x20e   :  { %2158 = vmatprep.mubr.msk.f32.mxu1 %vm2433_vm1, %v2430_v14  ;;  %v359_v4 = vpop.permute.xlu1 %358 }
 0x20f   :  { %v438_v12 = vpop.permute.xlu0 %437 }
 0x212   :  { %v517_v13 = vpop.permute.xlu1 %516 }
 0x213   :  { %v596_v19 = vpop.permute.xlu0 %595 }
 0x216   :  { %v675_v23 = vpop.permute.xlu1 %674 }
 0x217   :  { %v754_v34 = vpop.permute.xlu0 %753 }
 0x21a   :  { %v833_v45 = vpop.permute.xlu1 %832 }
 0x26d   :  { %v352_v1 = vpop.f32.mrb[2].mxu1 }
 0x26e   :  { %v353_v2 = vadd.f32 %v352_v1, %v279_v0  ;;  %v2115_v3 = vpop.f32.mrb[3].mxu1 }
 0x270   :  { %v909_v5 = vsel %vm281_vm5, %v353_v2, -inf }
 0x271   :  { %v431_v6 = vpop.f32.mrb[4].mxu1  ;;  %910 = vmax.xlane.f32.xlu0 %v909_v5 }
 0x272   :  { %v432_v7 = vadd.f32 %v431_v6, %v359_v4  ;;  %v2120_v8 = vpop.f32.mrb[5].mxu1 }
 0x274   :  { %v912_v10 = vsel %vm281_vm5, %v432_v7, -inf }
 0x275   :  { %913 = vmax.xlane.f32.xlu1 %v912_v10 }
 0x2d4   :  { %v510_v15 = vpop.f32.mrb[0].mxu0 }
 0x2d5   :  { %v511_v20 = vadd.f32 %v510_v15, %v438_v12  ;;  %v2125_v21 = vpop.f32.mrb[1].mxu0 }
 0x2d7   :  { %v915_v22 = vsel %vm281_vm5, %v511_v20, -inf }
 0x2d8   :  { %v589_v24 = vpop.f32.mrb[6].mxu1  ;;  %v668_v25 = vpop.f32.mrb[2].mxu0  ;;  %916 = vmax.xlane.f32.xlu0 %v915_v22 }
 0x2d9   :  { %v590_v26 = vadd.f32 %v589_v24, %v517_v13  ;;  %v669_v27 = vadd.f32 %v668_v25, %v596_v19  ;;  %v2130_v28 = vpop.f32.mrb[7].mxu1  ;;  %v2135_v31 = vpop.f32.mrb[3].mxu0 }
 0x2db   :  { %v918_v35 = vsel %vm281_vm5, %v590_v26, -inf  ;;  %v921_v36 = vsel %vm281_vm5, %v669_v27, -inf }
 0x2dc   :  { %v747_v39 = vpop.f32.mrb[8].mxu1  ;;  %v826_v40 = vpop.f32.mrb[4].mxu0  ;;  %919 = vmax.xlane.f32.xlu0 %v918_v35  ;;  %922 = vmax.xlane.f32.xlu1 %v921_v36 }
 0x2dd   :  { %v748_v41 = vadd.f32 %v747_v39, %v675_v23  ;;  %v827_v42 = vadd.f32 %v826_v40, %v754_v34  ;;  %v2140_v43 = vpop.f32.mrb[9].mxu1  ;;  %v2145_v44 = vpop.f32.mrb[5].mxu0 }
 0x2df   :  { %v924_v46 = vsel %vm281_vm5, %v748_v41, -inf  ;;  %v927_v47 = vsel %vm281_vm5, %v827_v42, -inf }
 0x2e0   :  { %v905_v48 = vpop.f32.mrb[10].mxu1  ;;  %925 = vmax.xlane.f32.xlu0 %v924_v46  ;;  %928 = vmax.xlane.f32.xlu1 %v927_v47 }
 0x2e1   :  { %v906_v49 = vadd.f32 %v905_v48, %v833_v45  ;;  %v2150_v50 = vpop.f32.mrb[11].mxu1 }
 0x2e3   :  { %v930_v51 = vsel %vm281_vm5, %v906_v49, -inf }
 0x2e4   :  { %931 = vmax.xlane.f32.xlu0 %v930_v51 }
 0x2f1   :  { %997 = vrot.lane.b32.xlu1 %v2527_v16, %s2437_s26 }
 0x2f5   :  { %1149 = vrot.lane.b32.xlu1 %v2556_v30, %s2437_s26 }
 0x2f9   :  { %1225 = vrot.lane.b32.xlu1 %v2562_v33, %s2437_s26 }
 0x2fa   :  { %1073 = vrot.lane.b32.xlu0 %v2536_v17, %s2437_s26 }
 0x2fd   :  { %1377 = vrot.lane.b32.xlu1 %v2560_v32, %s2437_s26 }
 0x2fe   :  { %1301 = vrot.lane.b32.xlu0 %v2554_v29, %s2437_s26  ;;  %v911_v54 = vpop.xlane.xlu0 %910 }
 0x2ff   :  { %v933_v55 = vsub.f32 %v353_v2, %v911_v54 }
 0x301   :  { %v941_v56 = vmul.f32 1.442695, %v933_v55 }
 0x302   :  { %v914_v52 = vpop.xlane.xlu1 %913 }
 0x303   :  { %v934_v53 = vsub.f32 %v432_v7, %v914_v52 }
 0x305   :  { %v943_v16 = vmul.f32 1.442695, %v934_v53 }
 0x307   :  { %2291 = vpow2.f32 %v943_v16 }
 0x308   :  { %2293 = vpow2.f32 %v941_v56 }
 0x311   :  { %v2662_v30 = vpop.eup %2291 }
 0x312   :  { %v960_v33 = vsel %vm281_vm5, %v2662_v30, 0.0  ;;  %v2666_v17 = vpop.eup %2293 }
 0x313   :  { %v957_v32 = vsel %vm281_vm5, %v2666_v17, 0.0 }
 0x31d   :  { %961 = vadd.xlane.f32.xlu0 %v960_v33 }
 0x321   :  { %958 = vadd.xlane.f32.xlu1 %v957_v32 }
 0x365   :  { %v917_v29 = vpop.xlane.xlu0 %916 }
 0x366   :  { %v935_v57 = vsub.f32 %v511_v20, %v917_v29 }
 0x368   :  { %v945_v58 = vmul.f32 1.442695, %v935_v57 }
 0x369   :  { %v923_v59 = vpop.xlane.xlu1 %922  ;;  %v920_v60 = vpop.xlane.xlu0 %919 }
 0x36a   :  { %2295 = vpow2.f32 %v945_v58  ;;  %v937_v61 = vsub.f32 %v669_v27, %v923_v59  ;;  %v936_v62 = vsub.f32 %v590_v26, %v920_v60 }
 0x36c   :  { %v949_v63 = vmul.f32 1.442695, %v937_v61  ;;  %v947_v0 = vmul.f32 1.442695, %v936_v62  ;;  %v64_v62 = vld [vmem:[#allocation7 + $0x20] sm:$0xff] }
 0x36d   :  { %v929_v1 = vpop.xlane.xlu1 %928  ;;  %v926_v2 = vpop.xlane.xlu0 %925 }
 0x36e   :  { %2297 = vpow2.f32 %v949_v63  ;;  %v939_v3 = vsub.f32 %v827_v42, %v929_v1  ;;  %v938_v4 = vsub.f32 %v748_v41, %v926_v2  ;;  %v65_v63 = vld [vmem:[#allocation7 + $0x28] sm:$0xff]  ;;  %v66_v1 = vld [vmem:[#allocation7 + $0x30] sm:$0xff]  ;;  %v67_v2 = vld [vmem:[#allocation7 + $0x38] sm:$0xff] }
 0x36f   :  { %2299 = vpow2.f32 %v947_v0  ;;  %v2240_v0 = vpack.c.bf16 %v65_v63, %v64_v62  ;;  %v77_v62 = vld [vmem:[#allocation7 + $0x88] sm:$0xff] }
 0x370   :  { %v953_v5 = vmul.f32 1.442695, %v939_v3  ;;  %v951_v6 = vmul.f32 1.442695, %v938_v4  ;;  %v2244_v3 = vpack.c.bf16 %v67_v2, %v66_v1 }
 0x371   :  { %v998_v7 = vpop.permute.xlu1 %997  ;;  %v932_v8 = vpop.xlane.xlu0 %931 }
 0x372   :  { %2301 = vpow2.f32 %v953_v5  ;;  %v940_v10 = vsub.f32 %v906_v49, %v932_v8  ;;  %2152 = vmatpush3.msra.mxu0 %v998_v7 }
 0x373   :  { %2303 = vpow2.f32 %v951_v6  ;;  %2161 = vmatprep.subr.mxu0 %v2430_v14 }
 0x374   :  { %v2296_v12 = vpop.eup %2295  ;;  %v955_v13 = vmul.f32 1.442695, %v940_v10 }
 0x375   :  { %v1074_v15 = vpop.permute.xlu0 %1073  ;;  %v963_v19 = vsel %vm281_vm5, %v2296_v12, 0.0  ;;  %v1150_v34 = vpop.permute.xlu1 %1149 }
 0x376   :  { %2305 = vpow2.f32 %v955_v13  ;;  %964 = vadd.xlane.f32.xlu1 %v963_v19  ;;  %2157 = vmatpush3.msra.mxu1 %v1074_v15 }
 0x377   :  { %2166 = vmatprep.subr.mxu1 %v2430_v14 }
 0x378   :  { %v2298_v20 = vpop.eup %2297 }
 0x379   :  { %v2300_v21 = vpop.eup %2299  ;;  %v969_v22 = vsel %vm281_vm5, %v2298_v20, 0.0  ;;  %v1226_v35 = vpop.permute.xlu1 %1225 }
 0x37a   :  { %970 = vadd.xlane.f32.xlu1 %v969_v22  ;;  %v966_v23 = vsel %vm281_vm5, %v2300_v21, 0.0  ;;  %v1302_v36 = vpop.permute.xlu0 %1301 }
 0x37b   :  { %967 = vadd.xlane.f32.xlu0 %v966_v23 }
 0x37c   :  { %v2302_v24 = vpop.eup %2301 }
 0x37d   :  { %v2304_v25 = vpop.eup %2303  ;;  %v975_v26 = vsel %vm281_vm5, %v2302_v24, 0.0  ;;  %v1378_v39 = vpop.permute.xlu1 %1377 }
 0x37e   :  { %976 = vadd.xlane.f32.xlu1 %v975_v26  ;;  %v972_v27 = vsel %vm281_vm5, %v2304_v25, 0.0 }
 0x37f   :  { %973 = vadd.xlane.f32.xlu0 %v972_v27 }
 0x380   :  { %v2677_v28 = vpop.eup %2305 }
 0x381   :  { %v978_v31 = vsel %vm281_vm5, %v2677_v28, 0.0 }
 0x383   :  { %979 = vadd.xlane.f32.xlu0 %v978_v31 }
 0x38f   :  { %1529 = vrot.lane.b32.xlu1 %v2574_v38, %s2437_s26 }
 0x399   :  { %1453 = vrot.lane.b32.xlu0 %v2568_v37, %s2437_s26 }
 0x3aa   :  { %v962_v40 = vpop.xlane.xlu0 %961 }
 0x3ab   :  { %2307 = vrcp.f32 %v962_v40 }
 0x3ae   :  { %v959_v41 = vpop.xlane.xlu1 %958 }
 0x3af   :  { %2309 = vrcp.f32 %v959_v41 }
 0x3b5   :  { %v2308_v42 = vpop.eup %2307 }
 0x3b6   :  { %v990_v43 = vmul.f32 %v2308_v42, %v2662_v30 }
 0x3b8   :  { %2159 = vmatmul.mubr.msk.f32.vlgmr.msra.gmra.mrb[12].mxu1 %vm281_vm5, %v990_v43 }
 0x3b9   :  { %v2310_v44 = vpop.eup %2309  ;;  %2167 = vmatpush3.msra.mxu1 %v1226_v35  ;;  %2168 = vmatprep.mubr.msk.f32.mxu1 %vm2433_vm1, %v2430_v14 }
 0x3ba   :  { %v989_v37 = vmul.f32 %v2310_v44, %v2666_v17  ;;  %2176 = vmatprep.subr.mxu1 %v2430_v14 }
 0x3bc   :  { %2154 = vmatmul.mubr.msk.f32.vlgmr.msra.gmra.mrb[6].mxu0 %vm281_vm5, %v989_v37 }
 0x3bd   :  { %2162 = vmatpush3.msra.mxu0 %v1150_v34  ;;  %2163 = vmatprep.mubr.msk.f32.mxu0 %vm2433_vm1, %v2430_v14 }
 0x3be   :  { %2171 = vmatprep.subr.mxu0 %v2430_v14 }
 0x403   :  { %v965_v38 = vpop.xlane.xlu1 %964 }
 0x404   :  { %2311 = vrcp.f32 %v965_v38 }
 0x407   :  { %v971_v45 = vpop.xlane.xlu1 %970 }
 0x408   :  { %2313 = vrcp.f32 %v971_v45  ;;  %v968_v46 = vpop.xlane.xlu0 %967 }
 0x409   :  { %2315 = vrcp.f32 %v968_v46 }
 0x40b   :  { %v977_v47 = vpop.xlane.xlu1 %976 }
 0x40c   :  { %2317 = vrcp.f32 %v977_v47  ;;  %v974_v48 = vpop.xlane.xlu0 %973 }
 0x40d   :  { %2319 = vrcp.f32 %v974_v48 }
 0x40e   :  { %v2312_v49 = vpop.eup %2311 }
 0x40f   :  { %v991_v50 = vmul.f32 %v2312_v49, %v2296_v12  ;;  %v1530_v32 = vpop.permute.xlu1 %1529 }
 0x410   :  { %v980_v51 = vpop.xlane.xlu0 %979 }
 0x411   :  { %2321 = vrcp.f32 %v980_v51  ;;  %2164 = vmatmul.mubr.msk.f32.vlgmr.msra.gmra.mrb[8].mxu0 %vm281_vm5, %v991_v50 }
 0x412   :  { %v2314_v52 = vpop.eup %2313  ;;  %2172 = vmatpush3.msra.mxu0 %v1302_v36  ;;  %2173 = vmatprep.mubr.msk.f32.mxu0 %vm2433_vm1, %v2430_v14 }
 0x413   :  { %v2316_v53 = vpop.eup %2315  ;;  %v993_v54 = vmul.f32 %v2314_v52, %v2298_v20  ;;  %2181 = vmatprep.subr.mxu0 %v2430_v14 }
 0x414   :  { %v992_v55 = vmul.f32 %v2316_v53, %v2300_v21  ;;  %v1454_v16 = vpop.permute.xlu0 %1453 }
 0x415   :  { %2174 = vmatmul.mubr.msk.f32.vlgmr.msra.gmra.mrb[10].mxu0 %vm281_vm5, %v993_v54 }
 0x416   :  { %v2318_v56 = vpop.eup %2317  ;;  %2169 = vmatmul.mubr.msk.f32.vlgmr.msra.gmra.mrb[14].mxu1 %vm281_vm5, %v992_v55  ;;  %2182 = vmatpush3.msra.mxu0 %v1454_v16  ;;  %v68_v55 = vld [vmem:[#allocation7 + $0x40] sm:$0xff]  ;;  %v69_v16 = vld [vmem:[#allocation7 + $0x48] sm:$0xff] }
 0x417   :  { %v2320_v30 = vpop.eup %2319  ;;  %v995_v33 = vmul.f32 %v2318_v56, %v2302_v24  ;;  %2177 = vmatpush3.msra.mxu1 %v1378_v39  ;;  %2178 = vmatprep.mubr.msk.f32.mxu1 %vm2433_vm1, %v2430_v14  ;;  %v1639_v39 = vsub.s32 1, %v2516_v9  ;;  %v2248_v56 = vpack.c.bf16 %v69_v16, %v68_v55 }
 0x418   :  { %v994_v17 = vmul.f32 %v2320_v30, %v2304_v25  ;;  %2183 = vmatprep.mubr.msk.f32.mxu0 %vm2433_vm1, %v2430_v14  ;;  %2186 = vmatprep.subr.mxu1 %v2430_v14  ;;  %v70_v30 = vld [vmem:[#allocation7 + $0x50] sm:$0xff] }
 0x419   :  { %2184 = vmatmul.mubr.msk.f32.vlgmr.msra.gmra.mrb[12].mxu0 %vm281_vm5, %v995_v33  ;;  %2241 = vmatprep.subr.bf16.mxu0 %v2240_v0  ;;  %v1640_v40 = vrot.slane %v2521_v11, %v1639_v39  ;;  %v71_v33 = vld [vmem:[#allocation7 + $0x58] sm:$0xff] }
 0x41a   :  { %2179 = vmatmul.mubr.msk.f32.vlgmr.msra.gmra.mrb[16].mxu1 %vm281_vm5, %v994_v17  ;;  %2243 = vmatpush3.bf16.msra.mxu0 %v2240_v0  ;;  %v2252_v17 = vpack.c.bf16 %v71_v33, %v70_v30 }
 0x41b   :  { %v2322_v29 = vpop.eup %2321  ;;  %2187 = vmatpush3.msra.mxu1 %v1530_v32  ;;  %2188 = vmatprep.mubr.msk.f32.mxu1 %vm2433_vm1, %v2430_v14  ;;  %v72_v32 = vld [vmem:[#allocation7 + $0x60] sm:$0xff] }
 0x41c   :  { %v996_v57 = vmul.f32 %v2322_v29, %v2677_v28  ;;  %2245 = vmatprep.subr.bf16.mxu0 %v2244_v3  ;;  %2249 = vmatprep.subr.bf16.mxu1 %v2248_v56  ;;  %v73_v29 = vld [vmem:[#allocation7 + $0x68] sm:$0xff] }
 0x41e   :  { %2189 = vmatmul.mubr.msk.f32.vlgmr.msra.gmra.mrb[18].mxu1 %vm281_vm5, %v996_v57  ;;  %2247 = vmatpush3.bf16.msra.mxu0 %v2244_v3  ;;  %v74_v57 = vld [vmem:[#allocation7 + $0x70] sm:$0xff] }
 0x41f   :  { %2251 = vmatpush3.bf16.msra.mxu1 %v2248_v56 }
 0x420   :  { %2253 = vmatprep.subr.bf16.mxu1 %v2252_v17 }
 0x423   :  { %2255 = vmatpush3.bf16.msra.mxu1 %v2252_v17 }
 0x48b   :  { %v1145_v58 = vpop.f32.mrb[12].mxu1 }
 0x48c   :  { %v2160_v59 = vpop.f32.mrb[13].mxu1 }
 0x48d   :  { %v75_v59 = vld [vmem:[#allocation7 + $0x78] sm:$0xff] }
 0x48f   :  { %v1069_v60 = vpop.f32.mrb[6].mxu0 }
 0x490   :  { %v2155_v61 = vpop.f32.mrb[7].mxu0 }
 0x491   :  { %v76_v61 = vld [vmem:[#allocation7 + $0x80] sm:$0xff] }
 0x492   :  { %v2264_v63 = vpack.c.bf16 %v77_v62, %v76_v61 }
 0x4e4   :  { %v1221_v4 = vpop.f32.mrb[8].mxu0 }
 0x4e5   :  { %v2165_v14 = vpop.f32.mrb[9].mxu0  ;;  %1607 = vrot.lane.b32.xlu0 %v1221_v4, %s2428_s25 }
 0x4e8   :  { %v1373_v5 = vpop.f32.mrb[10].mxu0 }
 0x4e9   :  { %v1297_v6 = vpop.f32.mrb[14].mxu1  ;;  %1615 = vrot.lane.b32.xlu0 %v1373_v5, %s2438_s27  ;;  %v2175_v7 = vpop.f32.mrb[11].mxu0  ;;  %v1751_v5 = vsub.s32 2, %v2516_v9 }
 0x4ea   :  { %1609 = vrot.lane.b32.xlu1 %v1297_v6, %s2428_s25  ;;  %v2170_v8 = vpop.f32.mrb[15].mxu1  ;;  %v1757_v6 = vsub.s32 3, %v2516_v9 }
 0x4eb   :  { %v1752_v7 = vrot.slane %v2521_v11, %v1751_v5 }
 0x4ec   :  { %v1525_v10 = vpop.f32.mrb[12].mxu0 }
 0x4ed   :  { %v1449_v12 = vpop.f32.mrb[16].mxu1  ;;  %1623 = vrot.lane.b32.xlu0 %v1525_v10, %s2439_s28  ;;  %v2185_v13 = vpop.f32.mrb[13].mxu0 }
 0x4ee   :  { %1617 = vrot.lane.b32.xlu1 %v1449_v12, %s2438_s27  ;;  %v2180_v15 = vpop.f32.mrb[17].mxu1  ;;  %v1758_v12 = vrot.slane %v2521_v11, %v1757_v6 }
 0x4f1   :  { %v1601_v19 = vpop.f32.mrb[18].mxu1 }
 0x4f2   :  { %1625 = vrot.lane.b32.xlu1 %v1601_v19, %s2439_s28  ;;  %v2190_v20 = vpop.f32.mrb[19].mxu1 }
 0x557   :  { %v1608_v21 = vpop.permute.xlu0 %1607 }
 0x558   :  { %v1629_v24 = vsel %vm281_vm5, %v1069_v60, %v1608_v21  ;;  %v2260_v60 = vpack.c.bf16 %v75_v59, %v74_v57 }
 0x55b   :  { %v1616_v22 = vpop.permute.xlu0 %1615 }
 0x55c   :  { %v1610_v23 = vpop.permute.xlu1 %1609  ;;  %v1632_v25 = vsel %vm1631_vm6, %v1629_v24, %v1616_v22  ;;  %v79_v24 = vld [vmem:[#allocation7 + $0x98] sm:$0xff] }
 0x55d   :  { %v1630_v31 = vsel %vm281_vm5, %v1145_v58, %v1610_v23  ;;  %v2256_v58 = vpack.c.bf16 %v73_v29, %v72_v32  ;;  %v78_v23 = vld [vmem:[#allocation7 + $0x90] sm:$0xff] }
 0x55f   :  { %v1624_v26 = vpop.permute.xlu0 %1623  ;;  %2257 = vmatprep.subr.bf16.mxu0 %v2256_v58 }
 0x560   :  { %v1618_v27 = vpop.permute.xlu1 %1617  ;;  %v1635_v28 = vsel %vm1634_vm7, %v1632_v25, %v1624_v26  ;;  %v2268_v25 = vpack.c.bf16 %v79_v24, %v78_v23  ;;  %v59_v26 = vld [vmem:[#allocation5 + $0x8] sm:$0xff] }
 0x561   :  { %2199 = vmatprep.mubr.msk.f32.mxu0 %vm85_vm0, %v1635_v28  ;;  %v1633_v34 = vsel %vm1631_vm6, %v1630_v31, %v1618_v27  ;;  %v2440_v27 = vmov 0   ;;  %vm1937_vm9 = vcmp.gt.f32.partialorder %v59_v26, 0.5 }
 0x562   :  { %2290 = vset.pattern.permute.xlu0 %v2440_v27  ;;  %2289 = vset.pattern.permute.xlu1 %v2440_v27  ;;  %v1938_v28 = vsel %vm1936_vm8, 1, %v2440_v27  ;;  %v1939_v31 = vsel %vm1937_vm9, 1, %v2440_v27 }
 0x564   :  { %v1626_v35 = vpop.permute.xlu1 %1625 }
 0x565   :  { %v1636_v36 = vsel %vm1634_vm7, %v1633_v34, %v1626_v35  ;;  %v1763_v34 = vsub.s32 4, %v2516_v9 }
 0x566   :  { %2200 = vmatmul.mubr.msk.f32.vlgmr.msra.gmra.mrb[14].mxu0 %vm85_vm0, %v1636_v36 }
 0x567   :  { %2259 = vmatpush3.bf16.msra.mxu0 %v2256_v58  ;;  %v1764_v35 = vrot.slane %v2521_v11, %v1763_v34 }
 0x568   :  { %2261 = vmatprep.subr.bf16.mxu0 %v2260_v60 }
 0x56b   :  { %2263 = vmatpush3.bf16.msra.mxu0 %v2260_v60 }
 0x56c   :  { %2265 = vmatprep.subr.bf16.mxu0 %v2264_v63 }
 0x56f   :  { %2267 = vmatpush3.bf16.msra.mxu0 %v2264_v63 }
 0x570   :  { %2269 = vmatprep.subr.bf16.mxu0 %v2268_v25 }
 0x573   :  { %2271 = vmatpush3.bf16.msra.mxu0 %v2268_v25 }
 0x639   :  { %v2201_v41 = vpop.f32.mrb[14].mxu0 }
 0x63a   :  { %v1719_v42 = vadd.f32 %v2201_v41, %v1640_v40  ;;  %v1713_v43 = vpop.f32.mrb[15].mxu0 }
 0x63b   :  { %v1714_v44 = vadd.f32 %v1713_v43, %v1640_v40 }
 0x63c   :  { %v1725_v37 = vsel %vm85_vm0, %v1719_v42, 0.0 }
 0x63d   :  { %1726 = vadd.xlane.f32.xlu1 %v1725_v37  ;;  %v1722_v38 = vsel %vm85_vm0, %v1714_v44, 0.0 }
 0x63e   :  { %1723 = vadd.xlane.f32.xlu0 %v1722_v38 }
 0x64e   :  { %1941 = vperm.xlu1 %2289, %v1938_v28  }
 0x6ca   :  { %v1727_v45 = vpop.xlane.xlu1 %1726 }
 0x6cb   :  { %v1730_v46 = vmul.f32 0.03125, %v1727_v45  ;;  %v1724_v47 = vpop.xlane.xlu0 %1723 }
 0x6cc   :  { %v1729_v48 = vmul.f32 0.03125, %v1724_v47 }
 0x6cd   :  { %v1732_v49 = vsub.f32 %v1719_v42, %v1730_v46 }
 0x6ce   :  { %v1731_v50 = vsub.f32 %v1714_v44, %v1729_v48  ;;  %v1851_v44 = vrot.slane %v2521_v11, %v1850_v18  ;;  %v1942_v45 = vpop.permute.xlu1 %1941 }
 0x6cf   :  { %v1734_v53 = vmul.f32 %v1732_v49, %v1732_v49  ;;  %vm1946_vm12 = vcmp.eq.s32.totalorder %v1942_v45, 1 }
 0x6d0   :  { %v1733_v51 = vmul.f32 %v1731_v50, %v1731_v50 }
 0x6d1   :  { %v1738_v54 = vsel %vm85_vm0, %v1734_v53, 0.0 }
 0x6d2   :  { %v1735_v52 = vsel %vm85_vm0, %v1733_v51, 0.0 }
 0x6d3   :  { %1736 = vadd.xlane.f32.xlu0 %v1735_v52 }
 0x6d7   :  { %1739 = vadd.xlane.f32.xlu0 %v1738_v54 }
 0x6ed   :  { %1944 = vperm.xlu0 %2290, %v1939_v31  }
 0x760   :  { %v1737_v0 = vpop.xlane.xlu0 %1736 }
 0x761   :  { %v1741_v1 = vmul.f32 0.03125, %v1737_v0 }
 0x763   :  { %v1743_v2 = vadd.f32 1e-05, %v1741_v1  ;;  %v1978_v1 = vsub.s32 6, %v2516_v9 }
 0x764   :  { %v1740_v3 = vpop.xlane.xlu0 %1739 }
 0x765   :  { %2323 = vrsqrt.f32 %v1743_v2  ;;  %v1742_v4 = vmul.f32 0.03125, %v1740_v3  ;;  %v1984_v2 = vsub.s32 7, %v2516_v9  ;;  %v1979_v3 = vrot.slane %v2521_v11, %v1978_v1 }
 0x767   :  { %v1744_v14 = vadd.f32 1e-05, %v1742_v4  ;;  %v1985_v5 = vrot.slane %v2521_v11, %v1984_v2 }
 0x769   :  { %2325 = vrsqrt.f32 %v1744_v14 }
 0x76c   :  { %v1945_v37 = vpop.permute.xlu0 %1944 }
 0x76d   :  { %vm1947_vm11 = vcmp.eq.s32.totalorder %v1945_v37, 1 }
 0x76f   :  { %v2324_v8 = vpop.eup %2323 }
 0x770   :  { %v1747_v10 = vmul.f32 %v2324_v8, %v1731_v50 }
 0x772   :  { %v1753_v13 = vmul.f32 %v1752_v7, %v1747_v10 }
 0x773   :  { %v2326_v15 = vpop.eup %2325 }
 0x774   :  { %v1748_v19 = vmul.f32 %v2326_v15, %v1732_v49  ;;  %v1759_v20 = vadd.f32 %v1758_v12, %v1753_v13 }
 0x776   :  { %v1754_v21 = vmul.f32 %v1752_v7, %v1748_v19  ;;  %2210 = vmatprep.mubr.msk.f32.mxu1 %vm85_vm0, %v1759_v20 }
 0x778   :  { %v1760_v22 = vadd.f32 %v1758_v12, %v1754_v21 }
 0x77a   :  { %2211 = vmatmul.mubr.msk.f32.vlgmr.msra.gmra.mrb[20].mxu1 %vm85_vm0, %v1760_v22 }
 0x84d   :  { %v2212_v36 = vpop.f32.mrb[20].mxu1 }
 0x84e   :  { %v1843_v39 = vadd.f32 %v2212_v36, %v1764_v35  ;;  %v1837_v40 = vpop.f32.mrb[21].mxu1 }
 0x84f   :  { %v1838_v41 = vadd.f32 %v1837_v40, %v1764_v35 }
 0x850   :  { %v1847_v43 = vmax.f32 %v1843_v39, 0.0 }
 0x851   :  { %v1846_v42 = vmax.f32 %v1838_v41, 0.0 }
 0x853   :  { %2229 = vmatprep.mubr.msk.f32.mxu0 %vm1852_vm10, %v1846_v42 }
 0x854   :  { %2230 = vmatmul.mubr.msk.f32.vlgmr.msra.gmra.mrb[16].mxu0 %vm1852_vm10, %v1847_v43 }
 0x927   :  { %v2231_v38 = vpop.f32.mrb[16].mxu0 }
 0x928   :  { %v1931_v46 = vadd.f32 %v2231_v38, %v1851_v44  ;;  %v1925_v47 = vpop.f32.mrb[17].mxu0 }
 0x929   :  { %v1926_v48 = vadd.f32 %v1925_v47, %v1851_v44 }
 0x92a   :  { %v1935_v49 = vmax.f32 %v1931_v46, 0.0 }
 0x92b   :  { %v1934_v50 = vmax.f32 %v1926_v48, 0.0 }
 0x92c   :  { %v1949_v51 = vsel %vm1947_vm11, 0.0, %v1935_v49 }
 0x92d   :  { %v1953_v52 = vsel %vm85_vm0, %v1949_v51, 0.0  ;;  %v1948_v53 = vsel %vm1946_vm12, 0.0, %v1934_v50 }
 0x92e   :  { %1954 = vadd.xlane.f32.xlu0 %v1953_v52  ;;  %v1950_v54 = vsel %vm85_vm0, %v1948_v53, 0.0 }
 0x92f   :  { %1951 = vadd.xlane.f32.xlu1 %v1950_v54 }
 0x9bb   :  { %v1955_v55 = vpop.xlane.xlu0 %1954 }
 0x9bc   :  { %v1957_v16 = vmul.f32 0.03125, %v1955_v55  ;;  %v1952_v56 = vpop.xlane.xlu1 %1951 }
 0x9bd   :  { %v1956_v30 = vmul.f32 0.03125, %v1952_v56 }
 0x9be   :  { %v1959_v33 = vsub.f32 %v1949_v51, %v1957_v16 }
 0x9bf   :  { %v1958_v17 = vsub.f32 %v1948_v53, %v1956_v30 }
 0x9c0   :  { %v1961_v57 = vmul.f32 %v1959_v33, %v1959_v33 }
 0x9c1   :  { %v1960_v32 = vmul.f32 %v1958_v17, %v1958_v17 }
 0x9c2   :  { %v1965_v58 = vsel %vm85_vm0, %v1961_v57, 0.0 }
 0x9c3   :  { %v1962_v29 = vsel %vm85_vm0, %v1960_v32, 0.0 }
 0x9c4   :  { %1963 = vadd.xlane.f32.xlu1 %v1962_v29 }
 0x9c8   :  { %1966 = vadd.xlane.f32.xlu1 %v1965_v58 }
 0xa51   :  { %v1964_v59 = vpop.xlane.xlu1 %1963 }
 0xa52   :  { %v1968_v60 = vmul.f32 0.03125, %v1964_v59 }
 0xa54   :  { %v1970_v61 = vadd.f32 1e-05, %v1968_v60 }
 0xa55   :  { %v1967_v62 = vpop.xlane.xlu1 %1966 }
 0xa56   :  { %2327 = vrsqrt.f32 %v1970_v61  ;;  %v1969_v63 = vmul.f32 0.03125, %v1967_v62 }
 0xa58   :  { %v1971_v0 = vadd.f32 1e-05, %v1969_v63 }
 0xa5a   :  { %2329 = vrsqrt.f32 %v1971_v0 }
 0xa60   :  { %v2328_v4 = vpop.eup %2327 }
 0xa61   :  { %v1974_v14 = vmul.f32 %v2328_v4, %v1958_v17 }
 0xa63   :  { %v1980_v6 = vmul.f32 %v1979_v3, %v1974_v14 }
 0xa64   :  { %v2330_v7 = vpop.eup %2329 }
 0xa65   :  { %v1975_v8 = vmul.f32 %v2330_v7, %v1959_v33  ;;  %v1986_v10 = vadd.f32 %v1985_v5, %v1980_v6 }
 0xa67   :  { %v1981_v12 = vmul.f32 %v1979_v3, %v1975_v8  ;;  %1988 = vst.msk [vmem:[#allocation8] sm:$0xff] %vm85_vm0, %v1986_v10 }
 0xa69   :  { %v1987_v13 = vadd.f32 %v1985_v5, %v1981_v12 }
 0xa6b   :  { %1989 = vst.msk [vmem:[#allocation8 + $0x8] sm:$0xff] %vm85_vm0, %v1987_v13 }
 0xa6c   :  { %2408 = shalt.err (!%p2405_p0)
}
 0xa6d   :  { %s2409_s7 = scalar_lea.hbm %s2763_s3, 256 }
 0xa6e   :  { %p2410_p1 = scmp.ne.s32.totalorder %s2763_s3, %s2409_s7  ;;  %p2413_p2 = scmp.lt.u32.totalorder %s2409_s7, %s2763_s3 }
 0xa70   :  { %p2415_p3 = pnand %p2413_p2, %p2410_p1 }
 0xa72   :  { %2418 = shalt.err (!%p2415_p3)
}
 0xa73   :  { %2001 = dma.vmem_to_hbm [thread:$0]  %s1996_s30, 256, %s2763_s3, [#allocation4], %s2427_s24, %s2427_s24, %s2428_s25  }
 0xa74   :  { %2423 = dma.done.wait [#allocation4], 256  }
 0xa75   :  { %2424 = vsyncadd [#allocation4], 4294967040 }
 0xa76   :  { %2005 = vsyncpa [#allocation3], 1 }
 0xa77   :  { %2006 = vsyncpa [#allocation6], 1 }
 0xa78   :  { %2007 = vsyncpa [#allocation4], 1 }

</bundles_post_ra>
